<compile_context>
chip_gen: v7x
topology: tpu7x:2x2x1
jax: 0.10.0
libtpu: 0.0.40
codegen_flags: <defaults>
</compile_context>

<pallas_src>
import math
from functools import partial

import jax
import jax.numpy as jnp
from jax.experimental import pallas as pl
from jax.experimental.pallas import tpu as pltpu


def _round_up(n, m):
    return ((n + m - 1) // m) * m


# ---------------------------------------------------------------------------
# Hot-path kernel: random-Fourier-feature map with lane-dense (transposed)
# output layout.
#
#   x block   : (row_tile, D)            rows on sublanes, D on lanes
#   og block  : (n_half, D)              generator output, PRE-SCALED by
#                                        sqrt(softmax_temp) in the wrapper
#   out block : (2*n_half + 1, row_tile) feature index on sublanes, rows on
#                                        lanes -> unmasked 128-lane stores
# ---------------------------------------------------------------------------
def _rff_kernel(x_ref, og_ref, out_ref, *, scale_out, smoothing, n_half):
    x = x_ref[...]                                   # (row_tile, D) f32
    og = og_ref[...]                                 # (n_half, D)   f32, pre-scaled
    # Contract on D:  (n_half, D) x (row_tile, D)^T -> (n_half, row_tile)
    # (same trans_b pattern as q @ k.T in flash attention).
    u = jax.lax.dot_general(
        og, x, (((1,), (1,)), ((), ())),
        preferred_element_type=jnp.float32)
    # Direct slice writes (no in-kernel concatenate); sublane offsets 0,
    # n_half and 2*n_half are 8-aligned for n_half = 16.
    out_ref[0:n_half, :] = jnp.cos(u) * scale_out
    out_ref[n_half:2 * n_half, :] = jnp.sin(u) * scale_out
    out_ref[2 * n_half:2 * n_half + 1, :] = jnp.full(
        (1, x.shape[0]), smoothing, dtype=jnp.float32)


# ---------------------------------------------------------------------------
# Wrapper
# ---------------------------------------------------------------------------
def smoothed_generative_rff(x, omega, w1, b1, w2, b2, *,
                            softmax_temp, n_dims, smoothing=1.0,
                            row_tile=2048):
    """x: (..., query_dims) float32.  Returns (..., 2*(n_dims//2) + 1)."""
    orig_shape = x.shape
    D = orig_shape[-1]
    n_half = n_dims // 2
    out_dim = 2 * n_half + 1

    # --- generator MLP on omega: tiny one-shot op, plain XLA.  Fold the
    #     sqrt(softmax_temp) input scale into the generator output so the hot
    #     kernel skips the per-element rescale of x.
    h = omega.astype(jnp.float32) @ w1 + b1
    h = jnp.where(h >= 0, h, 0.01 * h)                      # leaky_relu(0.01)
    omega_gen = jnp.tanh(h @ w2 + b2)                       # (n_half, D)
    og_scaled = (omega_gen *
                 jnp.float32(math.sqrt(softmax_temp))).astype(jnp.float32)

    # --- feature map, tiled over flattened rows.
    xf = x.reshape(-1, D).astype(jnp.float32)
    N = xf.shape[0]
    row_tile = max(128, min(row_tile, _round_up(N, 128)))   # lane-width multiple
    n_pad = _round_up(N, row_tile)
    if n_pad != N:
        xf = jnp.pad(xf, ((0, n_pad - N), (0, 0)))

    kernel = partial(_rff_kernel,
                     scale_out=math.sqrt(2.0 / n_dims),
                     smoothing=smoothing,
                     n_half=n_half)

    out_t = pl.pallas_call(
        kernel,
        out_shape=jax.ShapeDtypeStruct((out_dim, n_pad), jnp.float32),
        grid=(n_pad // row_tile,),
        in_specs=[
            pl.BlockSpec((row_tile, D), lambda i: (i, 0)),
            pl.BlockSpec((n_half, D), lambda i: (0, 0)),
        ],
        out_specs=pl.BlockSpec((out_dim, row_tile), lambda i: (0, i)),
        compiler_params=pltpu.CompilerParams(
            dimension_semantics=("parallel",)),
    )(xf, og_scaled)

    # Un-transpose once, outside the hot loop, and drop padded rows.
    out = out_t[:, :N].T
    return out.reshape(orig_shape[:-1] + (out_dim,))


# ---------------------------------------------------------------------------
# Pure-JAX reference (mirrors the PyTorch forward exactly)
# ---------------------------------------------------------------------------
def reference(x, omega, w1, b1, w2, b2, *, softmax_temp, n_dims, smoothing):
    h = omega @ w1 + b1
    h = jnp.where(h >= 0, h, 0.01 * h)
    og = jnp.tanh(h @ w2 + b2)                               # (n_half, D)
    xs = x * math.sqrt(softmax_temp)
    u = jnp.einsum('...d,hd->...h', xs, og)                  # (..., n_half)
    phi = jnp.concatenate([jnp.cos(u), jnp.sin(u)], axis=-1) * math.sqrt(2.0 / n_dims)
    smooth = jnp.full(phi.shape[:-1] + (1,), smoothing, dtype=phi.dtype)
    return jnp.concatenate([phi, smooth], axis=-1)


if __name__ == "__main__":
    # Module hyper-parameters (small, forward-consistent shapes).
    B, S, H, D = 2, 8, 4, 33            # query_dimensions = 33
    noise_dims = (16, 32)
    n_dims = D - 1                      # Smoothed variant: parent gets query_dims - 1
    n_half = n_dims // 2                # 16
    softmax_temp = 1.0 / math.sqrt(D)
    smoothing = 1.0

    key = jax.random.PRNGKey(0)
    kx, ko, k1, k2 = jax.random.split(key, 4)

    x = jax.random.normal(kx, (B, S, H, D), jnp.float32)
    # omega buffer as drawn by new_feature_map() (normal_()).
    omega = jax.random.normal(ko, (n_half, noise_dims[0]), jnp.float32)
    # Deterministic generator weights (assumed MLP, see TODO above).
    w1 = jax.random.normal(k1, (noise_dims[0], noise_dims[1]), jnp.float32) / math.sqrt(noise_dims[0])
    b1 = jnp.zeros((1, noise_dims[1]), jnp.float32)
    w2 = jax.random.normal(k2, (noise_dims[1], D), jnp.float32) / math.sqrt(noise_dims[1])
    b2 = jnp.zeros((1, D), jnp.float32)

    out = smoothed_generative_rff(
        x, omega, w1, b1, w2, b2,
        softmax_temp=softmax_temp, n_dims=n_dims, smoothing=smoothing)
    out = jax.block_until_ready(out)

    ref = reference(x, omega, w1, b1, w2, b2,
                    softmax_temp=softmax_temp, n_dims=n_dims, smoothing=smoothing)

    assert out.shape == (B, S, H, 2 * n_half + 1), out.shape
    assert jnp.allclose(out, ref, atol=1e-5, rtol=1e-5), float(jnp.max(jnp.abs(out - ref)))
    print("KERNEL_OK")
</pallas_src>

<mosaic_0001>
module attributes {stable_mosaic.version = 11 : i64} {
  func.func @_rff_kernel(%arg0: i32, %arg1: memref<128x33xf32, #tpu.memory_space<vmem>>, %arg2: memref<16x33xf32, #tpu.memory_space<vmem>>, %arg3: memref<33x128xf32, #tpu.memory_space<vmem>>) attributes {dimension_semantics = [#tpu.dimension_semantics<parallel>], iteration_bounds = array<i64: 1>, scalar_prefetch = 0 : i64, scratch_operands = 0 : i64, tpu.core_type = #tpu.core_type<tc>, window_params = [{transform_indices = @transform_0, window_bounds = array<i64: 128, 33>}, {pipeline_mode = #tpu.pipeline_mode<synchronous>, transform_indices = @transform_1, window_bounds = array<i64: 16, 33>}, {transform_indices = @transform_2, window_bounds = array<i64: 33, 128>}]} {
    %c0 = arith.constant 0 : index
    %c0_0 = arith.constant 0 : index
    %0 = vector.load %arg1[%c0, %c0_0] : memref<128x33xf32, #tpu.memory_space<vmem>>, vector<128x33xf32>
    %c0_1 = arith.constant 0 : index
    %c0_2 = arith.constant 0 : index
    %1 = vector.load %arg2[%c0_1, %c0_2] : memref<16x33xf32, #tpu.memory_space<vmem>>, vector<16x33xf32>
    %cst = arith.constant dense<0.000000e+00> : vector<16x128xf32>
    %2 = tpu.matmul %1, %0, %cst {dimension_numbers = #tpu.dot_dimension_numbers<[1], [1], [0], [0], [0, 0, 1, 0], [], []>} : vector<16x33xf32>, vector<128x33xf32>, vector<16x128xf32> -> vector<16x128xf32>
    %3 = math.cos %2 : vector<16x128xf32>
    %cst_3 = arith.constant 2.500000e-01 : f32
    %4 = vector.broadcast %cst_3 : f32 to vector<16x128xf32>
    %5 = arith.mulf %3, %4 : vector<16x128xf32>
    %c0_4 = arith.constant 0 : index
    %c0_5 = arith.constant 0 : index
    %6 = vector.load %arg3[%c0_4, %c0_5] : memref<33x128xf32, #tpu.memory_space<vmem>>, vector<16x128xf32>
    tpu.vector_store %arg3[%c0_4, %c0_5], %5 {strides = array<i32>} : memref<33x128xf32, #tpu.memory_space<vmem>>, vector<16x128xf32>,
    %7 = math.sin %2 : vector<16x128xf32>
    %cst_6 = arith.constant 2.500000e-01 : f32
    %8 = vector.broadcast %cst_6 : f32 to vector<16x128xf32>
    %9 = arith.mulf %7, %8 : vector<16x128xf32>
    %c16 = arith.constant 16 : index
    %c0_7 = arith.constant 0 : index
    %10 = vector.load %arg3[%c16, %c0_7] : memref<33x128xf32, #tpu.memory_space<vmem>>, vector<16x128xf32>
    tpu.vector_store %arg3[%c16, %c0_7], %9 {strides = array<i32>} : memref<33x128xf32, #tpu.memory_space<vmem>>, vector<16x128xf32>,
    %cst_8 = arith.constant 1.000000e+00 : f32
    %11 = vector.broadcast %cst_8 : f32 to vector<1x128xf32>
    %c32 = arith.constant 32 : index
    %c0_9 = arith.constant 0 : index
    %12 = vector.load %arg3[%c32, %c0_9] : memref<33x128xf32, #tpu.memory_space<vmem>>, vector<1x128xf32>
    tpu.vector_store %arg3[%c32, %c0_9], %11 {strides = array<i32>} : memref<33x128xf32, #tpu.memory_space<vmem>>, vector<1x128xf32>,
    return
  }
  func.func @transform_0(%arg0: i32) -> (i32, i32) {
    %c0_i32 = arith.constant 0 : i32
    %c0_i32_0 = arith.constant 0 : i32
    return %arg0, %c0_i32 : i32, i32
  }
  func.func @transform_1(%arg0: i32) -> (i32, i32) {
    %c0_i32 = arith.constant 0 : i32
    %c0_i32_0 = arith.constant 0 : i32
    %c0_i32_1 = arith.constant 0 : i32
    return %c0_i32, %c0_i32_0 : i32, i32
  }
  func.func @transform_2(%arg0: i32) -> (i32, i32) {
    %c0_i32 = arith.constant 0 : i32
    %c0_i32_0 = arith.constant 0 : i32
    return %c0_i32, %arg0 : i32, i32
  }
}

</mosaic_0001>

<bundles_post_ra>
// kernel: tpu_custom_call.1
= control target key start
LH: loop header
LB: loop body
LE: loop exit
PB: predicated region body
PF: predicated region fallthrough
CT: control target
= control target key end

     0   :  { %vm30_vm0 = vcmask 269312   ;;  %s977_s0 = inlined_call_operand.vmem [shape: f32[128,33], index: 0, kind: input, shape index: {}]   ;;  %s978_s1 = inlined_call_operand.vmem [shape: f32[16,33], index: 1, kind: input, shape index: {}]   ;;  %s979_s2 = inlined_call_operand.hbm [shape: f32[33,128], index: 2, kind: output, shape index: {}]  }
   0x1   :  { %v12_v0 = vld [vmem:[%s977_s0] sm:$0xff]  ;;  %v13_v1 = vld [vmem:[%s977_s0 + $0x8] sm:$0xff]  ;;  %v14_v2 = vld [vmem:[%s977_s0 + $0x10] sm:$0xff] }
   0x2   :  { %v686_v3 = vpack.c.bf16 %v13_v1, %v12_v0  ;;  %vm820_vm1 = vmpackc.low %vm30_vm0, %vm30_vm0  ;;  %v15_v5 = vld [vmem:[%s977_s0 + $0x18] sm:$0xff]  ;;  %v28_v7 = vld [vmem:[%s978_s1] sm:$0xff] }
   0x3   :  { %v692_v6 = vpack.c.bf16 %v15_v5, %v14_v2  ;;  %v16_v8 = vld [vmem:[%s977_s0 + $0x20] sm:$0xff]  ;;  %v17_v9 = vld [vmem:[%s977_s0 + $0x28] sm:$0xff]  ;;  %683 = vmatprep.mubr.msk.f32.mxu0 %vm30_vm0, %v28_v7 }
   0x4   :  { %688 = vmatprep.subr.msk.bf16.mxu0 %vm820_vm1, %v686_v3 }
   0x5   :  { %691 = vmatpush3.bf16.xpose.msk.msra.mxu0 %vm820_vm1, %v686_v3 }
   0x6   :  { %694 = vmatprep.subr.msk.bf16.mxu0 %vm820_vm1, %v692_v6 }
   0x7   :  { %7 = vsyncpa [#allocation3], 0  ;;  %v698_v10 = vpack.c.bf16 %v17_v9, %v16_v8  ;;  %v18_v11 = vld [vmem:[%s977_s0 + $0x30] sm:$0xff]  ;;  %v19_v12 = vld [vmem:[%s977_s0 + $0x38] sm:$0xff]  ;;  %v784_v27 = vmov 1.0  }
   0x8   :  { %v704_v13 = vpack.c.bf16 %v19_v12, %v18_v11  ;;  %v20_v14 = vld [vmem:[%s977_s0 + $0x40] sm:$0xff]  ;;  %v21_v15 = vld [vmem:[%s977_s0 + $0x48] sm:$0xff]  ;;  %v22_v17 = vld [vmem:[%s977_s0 + $0x50] sm:$0xff]  ;;  %582 = vst [vmem:[#allocation2 + $0x20] sm:$0x1] %v784_v27 }
   0x9   :  { %v710_v16 = vpack.c.bf16 %v21_v15, %v20_v14  ;;  %v23_v18 = vld [vmem:[%s977_s0 + $0x58] sm:$0xff]  ;;  %v24_v20 = vld [vmem:[%s977_s0 + $0x60] sm:$0xff]  ;;  %v25_v21 = vld [vmem:[%s977_s0 + $0x68] sm:$0xff]  ;;  %v785_v50 = vmov 683565275  }
   0xa   :  { %v716_v19 = vpack.c.bf16 %v23_v18, %v22_v17  ;;  %v722_v22 = vpack.c.bf16 %v25_v21, %v24_v20  ;;  %v26_v23 = vld [vmem:[%s977_s0 + $0x70] sm:$0xff]  ;;  %v27_v24 = vld [vmem:[%s977_s0 + $0x78] sm:$0xff]  ;;  %v29_v26 = vld [vmem:[%s978_s1 + $0x8] sm:$0xff]  ;;  %v786_v54 = vmov 2475754826   ;;  %s791_s0 = smov [#allocation2]  }
   0xb   :  { %v728_v25 = vpack.c.bf16 %v27_v24, %v26_v23  ;;  %v787_v56 = vmov 2131351028   ;;  %v788_v58 = vmov 2102212464   ;;  %v789_v60 = vmov 920167782  }
   0xc   :  { %v790_v3 = vmov 1326507024   ;;  %s588_s1 = sshll.u32 %s791_s0, 4  ;;  %s589_s1 = int_to_ptr.vmem [resolvable:$true] %s588_s1 }
   0xd   :  { %697 = vmatpush3.bf16.xpose.msk.msra.mxu0 %vm820_vm1, %v692_v6  ;;  %s760_s17 = scalar_lea.vmem %s589_s1, 640  ;;  %p765_p1 = scmp.lt.s32.totalorder %s589_s1, %s589_s1 }
   0xe   :  { %700 = vmatprep.subr.msk.bf16.mxu0 %vm820_vm1, %v698_v10  ;;  %p761_p0 = scmp.ne.s32.totalorder %s589_s1, %s760_s17  ;;  %p766_p2 = scmp.lt.s32.totalorder %s760_s17, %s760_s17 }
  0x10   :  { %p767_p3 = por %p766_p2, %p765_p1 }
  0x12   :  { %p768_p4 = pnand %p767_p3, %p761_p0 }
  0x15   :  { %703 = vmatpush3.bf16.xpose.msk.msra.mxu0 %vm820_vm1, %v698_v10 }
  0x16   :  { %706 = vmatprep.subr.msk.bf16.mxu0 %vm820_vm1, %v704_v13 }
  0x1d   :  { %709 = vmatpush3.bf16.xpose.msk.msra.mxu0 %vm820_vm1, %v704_v13 }
  0x1e   :  { %712 = vmatprep.subr.msk.bf16.mxu0 %vm820_vm1, %v710_v16 }
  0x25   :  { %715 = vmatpush3.bf16.xpose.msk.msra.mxu0 %vm820_vm1, %v710_v16 }
  0x26   :  { %718 = vmatprep.subr.msk.bf16.mxu0 %vm820_vm1, %v716_v19 }
  0x2d   :  { %721 = vmatpush3.bf16.xpose.msk.msra.mxu0 %vm820_vm1, %v716_v19 }
  0x2e   :  { %724 = vmatprep.subr.msk.bf16.mxu0 %vm820_vm1, %v722_v22 }
  0x35   :  { %727 = vmatpush3.bf16.xpose.msk.msra.mxu0 %vm820_vm1, %v722_v22 }
  0x36   :  { %730 = vmatprep.subr.msk.bf16.mxu0 %vm820_vm1, %v728_v25 }
  0x3d   :  { %733 = vmatpush3.bf16.xpose.msk.msra.mxu0 %vm820_vm1, %v728_v25 }
  0x44   :  { %684 = vmatmul.mubr.msk.f32.vlgmr.msra.gmra.mrb[0].mxu0 %vm30_vm0, %v29_v26 }
 0x117   :  { %v903_v28 = vpop.f32.mrb[0].mxu0 }
 0x118   :  { %v263_v29 = vand.u32 2147483647, %v903_v28  ;;  %v266_v30 = vand.u32 2139095040, %v903_v28  ;;  %v907_v31 = vpop.f32.mrb[1].mxu0  ;;  %vm265_vm0 = vcmp.lt.s32.totalorder %v903_v28, 0 }
 0x119   :  { %v163_v32 = vand.u32 2139095040, %v907_v31  ;;  %v160_v35 = vand.u32 2147483647, %v907_v31 }
 0x11a   :  { %v267_v33 = vshrl.u32 %v266_v30, 23  ;;  %v270_v34 = vand.u32 8388607, %v263_v29  ;;  %vm264_vm1 = vcmp.le.f32.partialorder %v263_v29, 0.7853982 }
 0x11b   :  { %v164_v36 = vshrl.u32 %v163_v32, 23  ;;  %v915_v41 = vand.u32 8388607, %v160_v35 }
 0x11c   :  { %v621_v37 = vadd.s32 4294967169, %v267_v33  ;;  %v271_v40 = vor.u32 8388608, %v270_v34 }
 0x11d   :  { %v617_v38 = vadd.s32 4294967169, %v164_v36  ;;  %v168_v48 = vor.u32 8388608, %v915_v41 }
 0x11e   :  { %v273_v39 = vadd.s32 1, %v621_v37  ;;  %v917_v47 = vshll.u32 %v271_v40, 8 }
 0x11f   :  { %v170_v42 = vadd.s32 1, %v617_v38 }
 0x120   :  { %vm274_vm2 = vcmp.gt.s32.totalorder %v273_v39, 0 }
 0x121   :  { %v275_v43 = vsel %vm274_vm2, %v273_v39, 0  ;;  %vm171_vm3 = vcmp.gt.s32.totalorder %v170_v42, 0  ;;  %vm162_vm2 = vcmp.lt.s32.totalorder %v907_v31, 0 }
 0x122   :  { %v276_v44 = vshrl.u32 %v275_v43, 5  ;;  %v277_v45 = vand.u32 31, %v275_v43  ;;  %v172_v46 = vsel %vm171_vm3, %v170_v42, 0  ;;  %v208_v42 = vshll.u32 %v168_v48, 8 }
 0x123   :  { %v920_v52 = vshrl.u32 %v172_v46, 5  ;;  %v174_v53 = vand.u32 31, %v172_v46  ;;  %vm161_vm3 = vcmp.le.f32.partialorder %v160_v35, 0.7853982 }
 0x124   :  { %v278_v49 = vsub.s32 32, %v277_v45  ;;  %v280_v51 = vshll.u32 %v785_v50, %v277_v45  ;;  %v283_v55 = vshll.u32 %v786_v54, %v277_v45  ;;  %v286_v57 = vshll.u32 %v787_v56, %v277_v45 }
 0x125   :  { %v289_v59 = vshll.u32 %v788_v58, %v277_v45  ;;  %v292_v61 = vshll.u32 %v789_v60, %v277_v45  ;;  %vm295_vm4 = vcmp.lt.s32.totalorder %v276_v44, 1  ;;  %vm296_vm5 = vcmp.lt.s32.totalorder %v276_v44, 2 }
 0x126   :  { %v281_v62 = vshrl.u32 %v786_v54, %v278_v49  ;;  %v284_v63 = vshrl.u32 %v787_v56, %v278_v49  ;;  %v287_v0 = vshrl.u32 %v788_v58, %v278_v49  ;;  %v279_v1 = vshrl.u32 %v785_v50, %v278_v49 }
 0x127   :  { %v290_v2 = vshrl.u32 %v789_v60, %v278_v49  ;;  %v293_v4 = vshrl.u32 %v790_v3, %v278_v49  ;;  %v175_v8 = vsub.s32 32, %v174_v53  ;;  %vm297_vm6 = vcmp.lt.s32.totalorder %v276_v44, 3 }
 0x128   :  { %v282_v5 = vor.u32 %v281_v62, %v280_v51  ;;  %v285_v6 = vor.u32 %v284_v63, %v283_v55  ;;  %v288_v7 = vor.u32 %v287_v0, %v286_v57  ;;  %vm298_vm7 = vcmp.lt.s32.totalorder %v276_v44, 4 }
 0x129   :  { %v291_v9 = vor.u32 %v290_v2, %v289_v59  ;;  %v294_v10 = vor.u32 %v293_v4, %v292_v61  ;;  %v177_v18 = vshll.u32 %v785_v50, %v174_v53  ;;  %v178_v21 = vshrl.u32 %v786_v54, %v175_v8 }
 0x12a   :  { %v299_v11 = vsel %vm295_vm4, %v279_v1, %v282_v5  ;;  %v300_v12 = vsel %vm298_vm7, %v288_v7, 2102212464  ;;  %v303_v13 = vsel %vm295_vm4, %v282_v5, %v285_v6  ;;  %v307_v14 = vsel %vm295_vm4, %v285_v6, %v288_v7 }
 0x12b   :  { %v301_v15 = vsel %vm297_vm6, %v285_v6, %v300_v12  ;;  %v304_v16 = vsel %vm298_vm7, %v291_v9, 920167782  ;;  %v308_v17 = vsel %vm298_vm7, %v294_v10, 1326507024  ;;  %v180_v22 = vshll.u32 %v786_v54, %v174_v53 }
 0x12c   :  { %v305_v19 = vsel %vm297_vm6, %v288_v7, %v304_v16  ;;  %v309_v20 = vsel %vm297_vm6, %v291_v9, %v308_v17  ;;  %v302_v23 = vsel %vm296_vm5, %v299_v11, %v301_v15  ;;  %v181_v26 = vshrl.u32 %v787_v56, %v175_v8 }
 0x12d   :  { %v306_v24 = vsel %vm296_vm5, %v303_v13, %v305_v19  ;;  %v310_v25 = vsel %vm296_vm5, %v307_v14, %v309_v20  ;;  %v179_v34 = vor.u32 %v178_v21, %v177_v18  ;;  %v183_v37 = vshll.u32 %v787_v56, %v174_v53 }
 0x12e   :  { %v929_v27 = vmul.u32.u64.low %v917_v47, %v310_v25  ;;  %v930_v30 = vmul.u32.u64.high %v917_v47, %v310_v25, %v929_v27  ;;  %v933_v32 = vmul.u32.u64.low %v917_v47, %v306_v24  ;;  %v934_v33 = vmul.u32.u64.high %v917_v47, %v306_v24, %v933_v32 }
 0x12f   :  { %v182_v36 = vor.u32 %v181_v26, %v180_v22  ;;  %v184_v38 = vshrl.u32 %v788_v58, %v175_v8  ;;  %v186_v39 = vshll.u32 %v788_v58, %v174_v53  ;;  %v187_v40 = vshrl.u32 %v789_v60, %v175_v8 }
 0x130   :  { %v190_v41 = vshrl.u32 %v790_v3, %v175_v8  ;;  %v318_v43 = vmul.u32 %v917_v47, %v302_v23  ;;  %v176_v44 = vshrl.u32 %v785_v50, %v175_v8  ;;  %v189_v46 = vshll.u32 %v789_v60, %v174_v53 }
 0x131   :  { %v185_v45 = vor.u32 %v184_v38, %v183_v37  ;;  %vm320_vm8 = vc.u32 %v930_v30, %v933_v32  ;;  %v321_v49 = vadd.s32 1, %v934_v33  ;;  %v188_v51 = vor.u32 %v187_v40, %v186_v39 }
 0x132   :  { %vm192_vm9 = vcmp.lt.s32.totalorder %v920_v52, 1  ;;  %v191_v54 = vor.u32 %v190_v41, %v189_v46  ;;  %vm194_vm10 = vcmp.lt.s32.totalorder %v920_v52, 3  ;;  %vm195_vm11 = vcmp.lt.s32.totalorder %v920_v52, 4 }
 0x133   :  { %v200_v55 = vsel %vm192_vm9, %v179_v34, %v182_v36  ;;  %v322_v48 = vsel %vm320_vm8, %v321_v49, %v934_v33  ;;  %v197_v56 = vsel %vm195_vm11, %v185_v45, 2102212464  ;;  %v201_v47 = vsel %vm195_vm11, %v188_v51, 920167782 }
 0x134   :  { %v204_v50 = vsel %vm192_vm9, %v182_v36, %v185_v45  ;;  %v323_v57 = vadd.s32 %v322_v48, %v318_v43  ;;  %vm193_vm12 = vcmp.lt.s32.totalorder %v920_v52, 2  ;;  %v202_v53 = vsel %vm194_vm10, %v185_v45, %v201_v47 }
 0x135   :  { %v205_v58 = vsel %vm195_vm11, %v191_v54, 1326507024  ;;  %v196_v59 = vsel %vm192_vm9, %v176_v44, %v179_v34  ;;  %v198_v60 = vsel %vm194_vm10, %v182_v36, %v197_v56  ;;  %v203_v61 = vsel %vm193_vm12, %v200_v55, %v202_v53 }
 0x136   :  { %v206_v62 = vsel %vm194_vm10, %v188_v51, %v205_v58  ;;  %v324_v63 = vadd.s32 536870912, %v323_v57  ;;  %v944_v1 = vmul.u32.u64.low %v208_v42, %v203_v61  ;;  %v945_v2 = vmul.u32.u64.high %v208_v42, %v203_v61, %v944_v1 }
 0x137   :  { %v207_v0 = vsel %vm193_vm12, %v204_v50, %v206_v62  ;;  %v199_v6 = vsel %vm193_vm12, %v196_v59, %v198_v60  ;;  %v319_v22 = vadd.s32 %v933_v32, %v930_v30  ;;  %vm355_vm10 = vweird.f32 %v903_v28 }
 0x138   :  { %v947_v3 = vmul.u32.u64.low %v208_v42, %v207_v0  ;;  %v948_v4 = vmul.u32.u64.high %v208_v42, %v207_v0, %v947_v3  ;;  %v325_v5 = vshrl.u32 %v324_v63, 30  ;;  %v218_v8 = vadd.s32 1, %v945_v2 }
 0x139   :  { %v215_v52 = vmul.u32 %v208_v42, %v199_v6 }
 0x13a   :  { %v326_v7 = vshll.u32 %v325_v5, 30  ;;  %vm217_vm13 = vc.u32 %v948_v4, %v944_v1  ;;  %v216_v43 = vadd.s32 %v944_v1, %v948_v4  ;;  %v349_v32 = vsub.s32 4, %v325_v5 }
 0x13b   :  { %v219_v10 = vsel %vm217_vm13, %v218_v8, %v945_v2 }
 0x13c   :  { %v327_v9 = vsub.s32 %v323_v57, %v326_v7  ;;  %v220_v11 = vadd.s32 %v219_v10, %v215_v52  ;;  %v350_v47 = vsel %vm265_vm0, %v349_v32, %v325_v5 }
 0x13d   :  { %v352_v53 = vsel %vm264_vm1, 0, %v350_v47 }
 0x13e   :  { %v329_v12 = vsub.s32 0, %v327_v9  ;;  %v221_v13 = vadd.s32 536870912, %v220_v11  ;;  %v567_v62 = vadd.s32 3, %v352_v53  ;;  %v356_v1 = vand.u32 3, %v352_v53 }
 0x140   :  { %v622_v14 = vmin.u32 %v329_v12, %v327_v9  ;;  %v222_v15 = vshrl.u32 %v221_v13, 30  ;;  %v568_v2 = vand.u32 3, %v567_v62  ;;  %vm358_vm4 = vcmp.eq.s32.totalorder %v356_v1, 0 }
 0x141   :  { %vm361_vm5 = vcmp.eq.s32.totalorder %v356_v1, 2  ;;  %vm357_vm8 = vcmp.lt.s32.totalorder %v356_v1, 2 }
 0x142   :  { %v331_v16 = vclz %v622_v14  ;;  %v223_v17 = vshll.u32 %v222_v15, 30  ;;  %v246_v61 = vsub.s32 4, %v222_v15  ;;  %vm573_vm6 = vcmp.eq.s32.totalorder %v568_v2, 2 }
 0x143   :  { %vm570_vm7 = vcmp.eq.s32.totalorder %v568_v2, 0  ;;  %vm569_vm9 = vcmp.lt.s32.totalorder %v568_v2, 2 }
 0x144   :  { %v623_v18 = vadd.s32 4294967294, %v331_v16  ;;  %v224_v19 = vsub.s32 %v220_v11, %v223_v17  ;;  %v247_v0 = vsel %vm162_vm2, %v246_v61, %v222_v15 }
 0x145   :  { %v249_v5 = vsel %vm161_vm3, 0, %v247_v0 }
 0x146   :  { %vm624_vm14 = vcmp.lt.s32.totalorder %v623_v18, 0  ;;  %v226_v21 = vsub.s32 0, %v224_v19  ;;  %v463_v35 = vadd.s32 3, %v249_v5 }
 0x147   :  { %v334_v20 = vsel %vm624_vm14, 0, %v623_v18  ;;  %v253_v18 = vand.u32 3, %v249_v5 }
 0x148   :  { %v335_v23 = vsub.s32 32, %v334_v20  ;;  %v339_v24 = vsub.s32 4294967266, %v334_v20  ;;  %v618_v25 = vmin.u32 %v226_v21, %v224_v19  ;;  %v336_v26 = vshll.u32 %v327_v9, %v334_v20 }
 0x149   :  { %vm258_vm11 = vcmp.eq.s32.totalorder %v253_v18, 2  ;;  %vm255_vm13 = vcmp.eq.s32.totalorder %v253_v18, 0 }
 0x14a   :  { %v337_v27 = vshrl.u32 %v319_v22, %v335_v23  ;;  %v340_v33 = vadd.s32 127, %v339_v24  ;;  %v228_v34 = vclz %v618_v25 }
 0x14c   :  { %v338_v36 = vor.u32 %v337_v27, %v336_v26  ;;  %v341_v37 = vshll.u32 %v340_v33, 23  ;;  %v619_v38 = vadd.s32 4294967294, %v228_v34 }
 0x14e   :  { %v342_v39 = vor.u32 4788187, %v341_v37  ;;  %vm620_vm15 = vcmp.lt.s32.totalorder %v619_v38, 0  ;;  %v345_v41 = vcvt.s32.f32 %v338_v36 }
 0x14f   :  { %v231_v42 = vsel %vm620_vm15, 0, %v619_v38  ;;  %vm254_vm15 = vcmp.lt.s32.totalorder %v253_v18, 2 }
 0x150   :  { %v343_v40 = vand.u32 2147483647, %v342_v39  ;;  %v232_v44 = vsub.s32 32, %v231_v42  ;;  %v236_v45 = vsub.s32 4294967266, %v231_v42  ;;  %v233_v46 = vshll.u32 %v224_v19, %v231_v42 }
 0x151   :  { %v464_v19 = vand.u32 3, %v463_v35 }
 0x152   :  { %v346_v30 = vmul.f32 %v345_v41, %v343_v40  ;;  %v234_v49 = vshrl.u32 %v216_v43, %v232_v44  ;;  %v237_v51 = vadd.s32 127, %v236_v45 }
 0x153   :  { %vm469_vm12 = vcmp.eq.s32.totalorder %v464_v19, 2  ;;  %vm466_vm14 = vcmp.eq.s32.totalorder %v464_v19, 0 }
 0x154   :  { %v347_v54 = vxor.u32 2147483648, %v346_v30  ;;  %v235_v55 = vor.u32 %v234_v49, %v233_v46  ;;  %v238_v48 = vshll.u32 %v237_v51, 23 }
 0x156   :  { %v348_v56 = vsel %vm265_vm0, %v347_v54, %v346_v30  ;;  %v239_v57 = vor.u32 4788187, %v238_v48  ;;  %v242_v59 = vcvt.s32.f32 %v235_v55  ;;  %vm465_vm0 = vcmp.lt.s32.totalorder %v464_v19, 2 }
 0x157   :  { %v351_v50 = vsel %vm264_vm1, %v903_v28, %v348_v56  ;;  %vm252_vm1 = vweird.f32 %v907_v31 }
 0x158   :  { %752 = vcosq.f32 %v351_v50  ;;  %v240_v58 = vand.u32 2147483647, %v239_v57 }
 0x159   :  { %754 = vsinq.f32 %v351_v50 }
 0x15a   :  { %v243_v60 = vmul.f32 %v242_v59, %v240_v58 }
 0x15c   :  { %v244_v63 = vxor.u32 2147483648, %v243_v60 }
 0x15e   :  { %v245_v29 = vsel %vm162_vm2, %v244_v63, %v243_v60 }
 0x15f   :  { %v248_v3 = vsel %vm161_vm3, %v907_v31, %v245_v29 }
 0x160   :  { %756 = vcosq.f32 %v248_v3 }
 0x161   :  { %758 = vsinq.f32 %v248_v3 }
 0x162   :  { %v753_v4 = vpop.eup %752 }
 0x163   :  { %v755_v6 = vpop.eup %754  ;;  %v362_v7 = vxor.u32 2147483648, %v753_v4 }
 0x164   :  { %v359_v8 = vxor.u32 2147483648, %v755_v6 }
 0x165   :  { %v363_v52 = vsel %vm361_vm5, %v362_v7, %v755_v6  ;;  %v575_v9 = vsel %vm573_vm6, %v362_v7, %v755_v6 }
 0x166   :  { %v360_v10 = vsel %vm358_vm4, %v753_v4, %v359_v8  ;;  %v572_v11 = vsel %vm570_vm7, %v753_v4, %v359_v8 }
 0x167   :  { %v364_v12 = vsel %vm357_vm8, %v360_v10, %v363_v52  ;;  %v576_v13 = vsel %vm569_vm9, %v572_v11, %v575_v9 }
 0x168   :  { %v365_v14 = vsel %vm355_vm10, nan, %v364_v12  ;;  %v577_v15 = vsel %vm355_vm10, nan, %v576_v13 }
 0x169   :  { %v367_v16 = vmul.f32 0.25, %v365_v14  ;;  %v579_v17 = vmul.f32 0.25, %v577_v15 }
 0x16a   :  { %v757_v20 = vpop.eup %756 }
 0x16b   :  { %369 = vst [vmem:[#allocation2 + $0x8] sm:$0xff] %v367_v16  ;;  %581 = vst [vmem:[#allocation2 + $0x18] sm:$0xff] %v579_v17  ;;  %v759_v21 = vpop.eup %758  ;;  %v259_v22 = vxor.u32 2147483648, %v757_v20 }
 0x16c   :  { %v256_v23 = vxor.u32 2147483648, %v759_v21 }
 0x16d   :  { %v260_v24 = vsel %vm258_vm11, %v259_v22, %v759_v21  ;;  %v471_v28 = vsel %vm469_vm12, %v259_v22, %v759_v21 }
 0x16e   :  { %v257_v25 = vsel %vm255_vm13, %v757_v20, %v256_v23  ;;  %v468_v26 = vsel %vm466_vm14, %v757_v20, %v256_v23 }
 0x16f   :  { %v261_v27 = vsel %vm254_vm15, %v257_v25, %v260_v24  ;;  %v472_v33 = vsel %vm465_vm0, %v468_v26, %v471_v28 }
 0x170   :  { %v262_v34 = vsel %vm252_vm1, nan, %v261_v27  ;;  %v473_v36 = vsel %vm252_vm1, nan, %v472_v33 }
 0x171   :  { %v366_v37 = vmul.f32 0.25, %v262_v34  ;;  %v578_v38 = vmul.f32 0.25, %v473_v36 }
 0x173   :  { %368 = vst [vmem:[#allocation2] sm:$0xff] %v366_v37  ;;  %580 = vst [vmem:[#allocation2 + $0x10] sm:$0xff] %v578_v38 }
 0x174   :  { %771 = shalt.err (!%p768_p4)
}
 0x175   :  { %s772_s20 = scalar_lea.hbm %s979_s2, 640 }
 0x176   :  { %p773_p5 = scmp.ne.s32.totalorder %s979_s2, %s772_s20  ;;  %p776_p6 = scmp.lt.u32.totalorder %s772_s20, %s979_s2 }
 0x178   :  { %p778_p7 = pnand %p776_p6, %p773_p5 }
 0x17a   :  { %781 = shalt.err (!%p778_p7)
}
 0x17b   :  { %s792_s25 = smov 128   ;;  %s793_s26 = smov 8  }
 0x17c   :  { %594 = dma.vmem_to_hbm [thread:$0]  %s589_s1, 640, %s979_s2, [#allocation3], %s792_s25, %s792_s25, %s793_s26  }
 0x17d   :  { %782 = dma.done.wait [#allocation3], 640  }
 0x17e   :  { %783 = vsyncadd [#allocation3], 4294966656 }
 0x17f   :  { %598 = vsyncpa [#allocation3], 1 }

</bundles_post_ra>
